<compile_context>
chip_gen: v7x
topology: tpu7x:2x2x1
jax: 0.10.0
libtpu: 0.0.40
codegen_flags: <defaults>
</compile_context>

<pallas_src>
import functools

import jax
import jax.numpy as jnp
from jax.experimental import pallas as pl
from jax.experimental.pallas import tpu as pltpu

EPSILON = 0.05
# NOTE: guards rsqrt for zero-gradient rows (incl. masked tail rows). This is a
# deliberate divergence from the PyTorch forward, which would produce inf/NaN.
_NORM_GUARD = 1e-30


def _cdiv(a, b):
    return -(-a // b)


def _round_up(x, m):
    return ((x + m - 1) // m) * m


def _at_kernel(emb_ref, grad_ref, w_ref, b_ref, out_ref, *,
               epsilon, compute_dtype, split_matmul):
    """One (TB, E) batch tile -> one (TB, O_pad) output tile."""
    g = grad_ref[...].astype(jnp.float32)                   # (TB, E)

    # Per-row reciprocal L2 norm; EPSILON folded into the (TB, 1) column so the
    # full-width tile only sees a single multiply. rsqrt -> EUP (free slot).
    sq = jnp.sum(g * g, axis=-1, keepdims=True)             # (TB, 1)
    scale = epsilon * jax.lax.rsqrt(jnp.maximum(sq, _NORM_GUARD))
    radv = g * scale                                        # (TB, E) f32

    w = w_ref[...]   # already in compute_dtype (pre-cast in the wrapper)
    if split_matmul:
        # bf16 MXU path: keep embedding and the (small) perturbation as separate
        # operands so radv isn't swallowed by the bf16 cast of (emb + radv).
        out = jnp.dot(emb_ref[...].astype(compute_dtype), w,
                      preferred_element_type=jnp.float32)
        out = out + jnp.dot(radv.astype(compute_dtype), w,
                            preferred_element_type=jnp.float32)
    else:
        new_embed = emb_ref[...].astype(jnp.float32) + radv  # (TB, E)
        out = jnp.dot(new_embed, w, preferred_element_type=jnp.float32)

    out_ref[...] = out + b_ref[...]                          # bias broadcast (1, O_pad)


def at_forward(embedding, embedding_grad, w, b, *, epsilon=EPSILON,
               tile_b=512, use_bf16_matmul=False,
               vmem_budget_bytes=48 * 1024 * 1024):
    """embedding, embedding_grad: (B, E) f32/bf16; w: (E, O); b: (O,) or (1, O)."""
    B, E = embedding.shape
    O = w.shape[1]
    b = jnp.asarray(b, jnp.float32).reshape(1, O)

    # ---- lane-dense output: pad O up to a multiple of 128 (unmasked vst) -----
    O_pad = _round_up(max(O, 128), 128)

    # Pre-cast W once in the wrapper; f32 accumulation preserved in the kernel.
    w_dtype = jnp.bfloat16 if use_bf16_matmul else jnp.float32
    w = w.astype(w_dtype)
    if O_pad != O:
        w = jnp.pad(w, ((0, 0), (0, O_pad - O)))
        b = jnp.pad(b, ((0, 0), (0, O_pad - O)))

    in_bytes = embedding.dtype.itemsize
    w_bytes = jnp.dtype(w_dtype).itemsize

    # ---- batch tile: biggest tile keeping the pipeline inside the per-TC VMEM
    # budget (48 MiB default is v7x-safe; raise toward ~96 MiB on v5e/v6e). ----
    fixed = E * O_pad * w_bytes + O_pad * 4              # W + b, single-buffered
    per_row = 2 * 2 * E * in_bytes + 2 * O_pad * 4       # emb+grad (2 bufs) + out (2 bufs)
    tb_cap = max(8, ((max(vmem_budget_bytes - fixed, 8 * per_row) // per_row) // 8) * 8)
    TB = max(8, min(_round_up(tile_b, 8), tb_cap, _round_up(B, 8)))
    # Keep >=2 grid steps when possible so the 'parallel' axis can shard across
    # both v7x TensorCores (near-free elsewhere: ~0.35 us per grid step).
    if B >= 16 and _cdiv(B, TB) < 2:
        TB = _round_up(_cdiv(B, 2), 8)
    grid_b = _cdiv(B, TB)   # no HBM pad copies: ragged tail block is masked

    footprint = per_row * TB + fixed
    vmem_limit = min(max(int(footprint * 1.3) + (2 << 20), 32 << 20), 100 << 20)

    compute_dtype = jnp.bfloat16 if use_bf16_matmul else jnp.float32
    kernel = functools.partial(_at_kernel, epsilon=epsilon,
                               compute_dtype=compute_dtype,
                               split_matmul=use_bf16_matmul)

    flops = (4 if use_bf16_matmul else 2) * B * E * O_pad + 3 * B * E
    bytes_accessed = (2 * B * E * in_bytes + E * O_pad * w_bytes
                      + B * O_pad * 4 + O_pad * 4)
    cost = pl.CostEstimate(flops=flops, transcendentals=B,
                           bytes_accessed=bytes_accessed)

    def _resident_spec(shape, single_buffer):
        idx = lambda i: (0,) * len(shape)
        if single_buffer:
            # Constant index_map never re-DMAs; one VMEM buffer is enough.
            return pl.BlockSpec(shape, idx, pipeline_mode=pl.Buffered(1))
        return pl.BlockSpec(shape, idx)

    def _run(single_buffer_resident):
        return pl.pallas_call(
            kernel,
            out_shape=jax.ShapeDtypeStruct((B, O_pad), jnp.float32),
            grid=(grid_b,),
            in_specs=[
                pl.BlockSpec((TB, E), lambda i: (i, 0)),                  # embedding tile
                pl.BlockSpec((TB, E), lambda i: (i, 0)),                  # grad tile
                _resident_spec((E, O_pad), single_buffer_resident),       # W resident
                _resident_spec((1, O_pad), single_buffer_resident),       # b resident
            ],
            out_specs=pl.BlockSpec((TB, O_pad), lambda i: (i, 0)),
            compiler_params=pltpu.CompilerParams(
                dimension_semantics=("parallel",),
                vmem_limit_bytes=vmem_limit),
            cost_estimate=cost,
        )(embedding, embedding_grad, w, b)

    # TODO(synk): for very large E or W, add a 'parallel' axis tiling O_pad and
    # an 'arbitrary' K axis over E (accumulate emb_k@W_k, g_k@W_k, sum(g_k^2) and
    # combine distributively) so no resident tile exceeds v7x's 64 MiB per-TC VMEM.
    try:
        out = _run(True)      # W/b single-buffered
    except Exception:         # jax versions rejecting Buffered(1) on pallas_call
        out = _run(False)

    return out if O_pad == O else out[:, :O]


if __name__ == "__main__":
    # Small shapes consistent with the module: embedding is (batch, embedding).
    B, E, O = 8, 128, 16

    key = jax.random.PRNGKey(0)
    k_emb, k_grad, k_w, k_b = jax.random.split(key, 4)

    embedding = jax.random.normal(k_emb, (B, E), dtype=jnp.float32)
    embedding_grad = jax.random.normal(k_grad, (B, E), dtype=jnp.float32)

    # Deterministic parameters for after_embedding (a Linear head E -> O).
    w = jax.random.normal(k_w, (E, O), dtype=jnp.float32) * 0.02
    b = jax.random.normal(k_b, (1, O), dtype=jnp.float32) * 0.01

    out = jax.block_until_ready(at_forward(embedding, embedding_grad, w, b))

    # Pure-JAX reference (same semantics as the PyTorch forward).
    reci = 1.0 / jnp.sqrt(jnp.sum(embedding_grad ** 2, axis=-1, keepdims=True))
    new_embed = embedding + EPSILON * embedding_grad * reci
    ref = new_embed @ w + b
    assert out.shape == (B, O)
    assert jnp.allclose(out, ref, atol=1e-5, rtol=1e-5), "f32 mismatch vs reference"

    # bf16-MXU path: W pre-cast in the wrapper, perturbation kept as its own operand.
    out_bf16 = jax.block_until_ready(
        at_forward(embedding, embedding_grad, w, b, use_bf16_matmul=True))
    assert out_bf16.shape == (B, O)
    assert jnp.allclose(out_bf16, ref, atol=3e-2, rtol=3e-2), "bf16 mismatch vs reference"

    print("KERNEL_OK")
</pallas_src>

<mosaic_0001>
module attributes {stable_mosaic.version = 11 : i64} {
  func.func @_at_kernel(%arg0: i32, %arg1: memref<8x128xf32, #tpu.memory_space<vmem>>, %arg2: memref<8x128xf32, #tpu.memory_space<vmem>>, %arg3: memref<128x128xf32, #tpu.memory_space<vmem>>, %arg4: memref<1x128xf32, #tpu.memory_space<vmem>>, %arg5: memref<8x128xf32, #tpu.memory_space<vmem>>) attributes {dimension_semantics = [#tpu.dimension_semantics<parallel>], iteration_bounds = array<i64: 1>, scalar_prefetch = 0 : i64, scratch_operands = 0 : i64, tpu.core_type = #tpu.core_type<tc>, window_params = [{transform_indices = @transform_0, window_bounds = array<i64: 8, 128>}, {transform_indices = @transform_1, window_bounds = array<i64: 8, 128>}, {pipeline_mode = #tpu.pipeline_mode<synchronous>, transform_indices = @transform_2, window_bounds = array<i64: 128, 128>}, {pipeline_mode = #tpu.pipeline_mode<synchronous>, transform_indices = @transform_3, window_bounds = array<i64: 1, 128>}, {transform_indices = @transform_4, window_bounds = array<i64: 8, 128>}]} {
    %c0 = arith.constant 0 : index
    %c0_0 = arith.constant 0 : index
    %0 = vector.load %arg2[%c0, %c0_0] : memref<8x128xf32, #tpu.memory_space<vmem>>, vector<8x128xf32>
    %1 = arith.mulf %0, %0 : vector<8x128xf32>
    %cst = arith.constant dense<0.000000e+00> : vector<8xf32>
    %2 = vector.multi_reduction <add>, %1, %cst [1] : vector<8x128xf32> to vector<8xf32>
    %3 = vector.shape_cast %2 : vector<8xf32> to vector<8x1xf32>
    %cst_1 = arith.constant 1.000000e-30 : f32
    %4 = vector.broadcast %cst_1 : f32 to vector<8x1xf32>
    %5 = arith.maximumf %3, %4 : vector<8x1xf32>
    %6 = math.rsqrt %5 : vector<8x1xf32>
    %cst_2 = arith.constant 5.000000e-02 : f32
    %7 = vector.broadcast %cst_2 : f32 to vector<8x1xf32>
    %8 = arith.mulf %7, %6 : vector<8x1xf32>
    %9 = vector.broadcast %8 : vector<8x1xf32> to vector<8x128xf32>
    %10 = arith.mulf %0, %9 : vector<8x128xf32>
    %c0_3 = arith.constant 0 : index
    %c0_4 = arith.constant 0 : index
    %11 = vector.load %arg3[%c0_3, %c0_4] : memref<128x128xf32, #tpu.memory_space<vmem>>, vector<128x128xf32>
    %c0_5 = arith.constant 0 : index
    %c0_6 = arith.constant 0 : index
    %12 = vector.load %arg1[%c0_5, %c0_6] : memref<8x128xf32, #tpu.memory_space<vmem>>, vector<8x128xf32>
    %13 = arith.addf %12, %10 : vector<8x128xf32>
    %cst_7 = arith.constant dense<0.000000e+00> : vector<8x128xf32>
    %14 = tpu.matmul %13, %11, %cst_7 {dimension_numbers = #tpu.dot_dimension_numbers<[1], [0], [0], [1], [0, 0, 1, 1], [], []>} : vector<8x128xf32>, vector<128x128xf32>, vector<8x128xf32> -> vector<8x128xf32>
    %c0_8 = arith.constant 0 : index
    %c0_9 = arith.constant 0 : index
    %15 = vector.load %arg4[%c0_8, %c0_9] : memref<1x128xf32, #tpu.memory_space<vmem>>, vector<1x128xf32>
    %16 = vector.broadcast %15 : vector<1x128xf32> to vector<8x128xf32>
    %17 = arith.addf %14, %16 : vector<8x128xf32>
    %c0_10 = arith.constant 0 : index
    %c0_11 = arith.constant 0 : index
    %18 = vector.load %arg5[%c0_10, %c0_11] : memref<8x128xf32, #tpu.memory_space<vmem>>, vector<8x128xf32>
    tpu.vector_store %arg5[%c0_10, %c0_11], %17 {strides = array<i32>} : memref<8x128xf32, #tpu.memory_space<vmem>>, vector<8x128xf32>,
    return
  }
  func.func @transform_0(%arg0: i32) -> (i32, i32) {
    %c0_i32 = arith.constant 0 : i32
    %c0_i32_0 = arith.constant 0 : i32
    return %arg0, %c0_i32 : i32, i32
  }
  func.func @transform_1(%arg0: i32) -> (i32, i32) {
    %c0_i32 = arith.constant 0 : i32
    %c0_i32_0 = arith.constant 0 : i32
    return %arg0, %c0_i32 : i32, i32
  }
  func.func @transform_2(%arg0: i32) -> (i32, i32) {
    %c0_i32 = arith.constant 0 : i32
    %c0_i32_0 = arith.constant 0 : i32
    %c0_i32_1 = arith.constant 0 : i32
    return %c0_i32, %c0_i32_0 : i32, i32
  }
  func.func @transform_3(%arg0: i32) -> (i32, i32) {
    %c0_i32 = arith.constant 0 : i32
    %c0_i32_0 = arith.constant 0 : i32
    %c0_i32_1 = arith.constant 0 : i32
    return %c0_i32, %c0_i32_0 : i32, i32
  }
  func.func @transform_4(%arg0: i32) -> (i32, i32) {
    %c0_i32 = arith.constant 0 : i32
    %c0_i32_0 = arith.constant 0 : i32
    return %arg0, %c0_i32 : i32, i32
  }
}

module attributes {stable_mosaic.version = 11 : i64} {
  func.func @_at_kernel(%arg0: i32, %arg1: memref<8x128xf32, #tpu.memory_space<vmem>>, %arg2: memref<8x128xf32, #tpu.memory_space<vmem>>, %arg3: memref<128x128xf32, #tpu.memory_space<vmem>>, %arg4: memref<1x128xf32, #tpu.memory_space<vmem>>, %arg5: memref<8x128xf32, #tpu.memory_space<vmem>>) attributes {dimension_semantics = [#tpu.dimension_semantics<parallel>], iteration_bounds = array<i64: 1>, scalar_prefetch = 0 : i64, scratch_operands = 0 : i64, tpu.core_type = #tpu.core_type<tc>, window_params = [{transform_indices = @transform_0, window_bounds = array<i64: 8, 128>}, {transform_indices = @transform_1, window_bounds = array<i64: 8, 128>}, {pipeline_mode = #tpu.pipeline_mode<synchronous>, transform_indices = @transform_2, window_bounds = array<i64: 128, 128>}, {pipeline_mode = #tpu.pipeline_mode<synchronous>, transform_indices = @transform_3, window_bounds = array<i64: 1, 128>}, {transform_indices = @transform_4, window_bounds = array<i64: 8, 128>}]} {
    %c0 = arith.constant 0 : index
    %c0_0 = arith.constant 0 : index
    %0 = vector.load %arg2[%c0, %c0_0] : memref<8x128xf32, #tpu.memory_space<vmem>>, vector<8x128xf32>
    %1 = arith.mulf %0, %0 : vector<8x128xf32>
    %cst = arith.constant dense<0.000000e+00> : vector<8xf32>
    %2 = vector.multi_reduction <add>, %1, %cst [1] : vector<8x128xf32> to vector<8xf32>
    %3 = vector.shape_cast %2 : vector<8xf32> to vector<8x1xf32>
    %cst_1 = arith.constant 1.000000e-30 : f32
    %4 = vector.broadcast %cst_1 : f32 to vector<8x1xf32>
    %5 = arith.maximumf %3, %4 : vector<8x1xf32>
    %6 = math.rsqrt %5 : vector<8x1xf32>
    %cst_2 = arith.constant 5.000000e-02 : f32
    %7 = vector.broadcast %cst_2 : f32 to vector<8x1xf32>
    %8 = arith.mulf %7, %6 : vector<8x1xf32>
    %9 = vector.broadcast %8 : vector<8x1xf32> to vector<8x128xf32>
    %10 = arith.mulf %0, %9 : vector<8x128xf32>
    %c0_3 = arith.constant 0 : index
    %c0_4 = arith.constant 0 : index
    %11 = vector.load %arg3[%c0_3, %c0_4] : memref<128x128xf32, #tpu.memory_space<vmem>>, vector<128x128xf32>
    %c0_5 = arith.constant 0 : index
    %c0_6 = arith.constant 0 : index
    %12 = vector.load %arg1[%c0_5, %c0_6] : memref<8x128xf32, #tpu.memory_space<vmem>>, vector<8x128xf32>
    %13 = arith.addf %12, %10 : vector<8x128xf32>
    %cst_7 = arith.constant dense<0.000000e+00> : vector<8x128xf32>
    %14 = tpu.matmul %13, %11, %cst_7 {dimension_numbers = #tpu.dot_dimension_numbers<[1], [0], [0], [1], [0, 0, 1, 1], [], []>} : vector<8x128xf32>, vector<128x128xf32>, vector<8x128xf32> -> vector<8x128xf32>
    %c0_8 = arith.constant 0 : index
    %c0_9 = arith.constant 0 : index
    %15 = vector.load %arg4[%c0_8, %c0_9] : memref<1x128xf32, #tpu.memory_space<vmem>>, vector<1x128xf32>
    %16 = vector.broadcast %15 : vector<1x128xf32> to vector<8x128xf32>
    %17 = arith.addf %14, %16 : vector<8x128xf32>
    %c0_10 = arith.constant 0 : index
    %c0_11 = arith.constant 0 : index
    %18 = vector.load %arg5[%c0_10, %c0_11] : memref<8x128xf32, #tpu.memory_space<vmem>>, vector<8x128xf32>
    tpu.vector_store %arg5[%c0_10, %c0_11], %17 {strides = array<i32>} : memref<8x128xf32, #tpu.memory_space<vmem>>, vector<8x128xf32>,
    return
  }
  func.func @transform_0(%arg0: i32) -> (i32, i32) {
    %c0_i32 = arith.constant 0 : i32
    %c0_i32_0 = arith.constant 0 : i32
    return %arg0, %c0_i32 : i32, i32
  }
  func.func @transform_1(%arg0: i32) -> (i32, i32) {
    %c0_i32 = arith.constant 0 : i32
    %c0_i32_0 = arith.constant 0 : i32
    return %arg0, %c0_i32 : i32, i32
  }
  func.func @transform_2(%arg0: i32) -> (i32, i32) {
    %c0_i32 = arith.constant 0 : i32
    %c0_i32_0 = arith.constant 0 : i32
    %c0_i32_1 = arith.constant 0 : i32
    return %c0_i32, %c0_i32_0 : i32, i32
  }
  func.func @transform_3(%arg0: i32) -> (i32, i32) {
    %c0_i32 = arith.constant 0 : i32
    %c0_i32_0 = arith.constant 0 : i32
    %c0_i32_1 = arith.constant 0 : i32
    return %c0_i32, %c0_i32_0 : i32, i32
  }
  func.func @transform_4(%arg0: i32) -> (i32, i32) {
    %c0_i32 = arith.constant 0 : i32
    %c0_i32_0 = arith.constant 0 : i32
    return %arg0, %c0_i32 : i32, i32
  }
}

</mosaic_0001>

<bundles_post_ra>
// kernel: tpu_custom_call.1
= control target key start
LH: loop header
LB: loop body
LE: loop exit
PB: predicated region body
PF: predicated region fallthrough
CT: control target
= control target key end

     0   :  { %9 = vsyncpa [#allocation3], 0  ;;  %s442_s0 = inlined_call_operand.hbm [shape: f32[8,128], index: 0, kind: input, shape index: {}]   ;;  %s443_s1 = inlined_call_operand.hbm [shape: f32[8,128], index: 1, kind: input, shape index: {}]   ;;  %s444_s2 = inlined_call_operand.hbm [shape: f32[128,128], index: 2, kind: input, shape index: {}]   ;;  %s445_s3 = inlined_call_operand.vmem [shape: f32[1,128], index: 3, kind: input, shape index: {}]   ;;  %s446_s4 = inlined_call_operand.hbm [shape: f32[8,128], index: 4, kind: output, shape index: {}]  }
   0x1   :  { %10 = vsyncpa [#allocation6], 0 }
   0x2   :  { %11 = vsyncpa [#allocation4], 0  ;;  %s357_s15 = smov [#allocation5]   ;;  %s358_s17 = smov [#allocation2]  }
   0x3   :  { %s28_s16 = sshll.u32 %s357_s15, 4  ;;  %s18_s18 = sshll.u32 %s358_s17, 4  ;;  %s29_s16 = int_to_ptr.vmem [resolvable:$true] %s28_s16  ;;  %s19_s18 = int_to_ptr.vmem [resolvable:$true] %s18_s18 }
   0x4   :  { %s263_s21 = scalar_lea.hbm %s443_s1, 128 }
   0x5   :  { %p264_p0 = scmp.ne.s32.totalorder %s443_s1, %s263_s21  ;;  %p267_p1 = scmp.lt.u32.totalorder %s263_s21, %s443_s1 }
   0x7   :  { %p269_p2 = pnand %p267_p1, %p264_p0 }
   0x9   :  { %272 = shalt.err (!%p269_p2)
}
   0xa   :  { %s273_s26 = scalar_lea.vmem %s29_s16, 128  ;;  %p278_p4 = scmp.lt.s32.totalorder %s29_s16, %s29_s16 }
   0xb   :  { %p274_p3 = scmp.ne.s32.totalorder %s29_s16, %s273_s26  ;;  %p279_p5 = scmp.lt.s32.totalorder %s273_s26, %s273_s26 }
   0xd   :  { %p280_p6 = por %p279_p5, %p278_p4 }
   0xf   :  { %p281_p7 = pnand %p280_p6, %p274_p3 }
  0x11   :  { %284 = shalt.err (!%p281_p7)
}
  0x12   :  { %31 = dma.hbm_to_vmem [thread:$0]  %s443_s1, 128, %s29_s16, [#allocation6]  }
  0x13   :  { %s285_s5 = scalar_lea.hbm %s442_s0, 128 }
  0x14   :  { %p286_p8 = scmp.ne.s32.totalorder %s442_s0, %s285_s5  ;;  %p289_p9 = scmp.lt.u32.totalorder %s285_s5, %s442_s0 }
  0x16   :  { %p291_p10 = pnand %p289_p9, %p286_p8 }
  0x18   :  { %294 = shalt.err (!%p291_p10)
}
  0x19   :  { %s295_s10 = scalar_lea.vmem %s19_s18, 128  ;;  %p300_p12 = scmp.lt.s32.totalorder %s19_s18, %s19_s18 }
  0x1a   :  { %p296_p11 = scmp.ne.s32.totalorder %s19_s18, %s295_s10  ;;  %p301_p13 = scmp.lt.s32.totalorder %s295_s10, %s295_s10 }
  0x1c   :  { %p302_p0 = por %p301_p13, %p300_p12 }
  0x1e   :  { %p303_p1 = pnand %p302_p0, %p296_p11 }
  0x20   :  { %306 = shalt.err (!%p303_p1)
}
  0x21   :  { %21 = dma.hbm_to_vmem [thread:$0]  %s442_s0, 128, %s19_s18, [#allocation3]  }
  0x22   :  { %s359_s12 = smov [#allocation7]   ;;  %s307_s16 = scalar_lea.hbm %s444_s2, 2048 }
  0x23   :  { %s37_s13 = sshll.u32 %s359_s12, 4  ;;  %p308_p2 = scmp.ne.s32.totalorder %s444_s2, %s307_s16  ;;  %s38_s13 = int_to_ptr.vmem [resolvable:$true] %s37_s13 }
  0x24   :  { %p311_p3 = scmp.lt.u32.totalorder %s307_s16, %s444_s2 }
  0x26   :  { %p313_p4 = pnand %p311_p3, %p308_p2 }
  0x28   :  { %316 = shalt.err (!%p313_p4)
}
  0x29   :  { %s317_s22 = scalar_lea.vmem %s38_s13, 2048  ;;  %p322_p6 = scmp.lt.s32.totalorder %s38_s13, %s38_s13 }
  0x2a   :  { %p318_p5 = scmp.ne.s32.totalorder %s38_s13, %s317_s22  ;;  %p323_p7 = scmp.lt.s32.totalorder %s317_s22, %s317_s22 }
  0x2c   :  { %p324_p8 = por %p323_p7, %p322_p6 }
  0x2e   :  { %p325_p9 = pnand %p324_p8, %p318_p5 }
  0x30   :  { %328 = shalt.err (!%p325_p9)
}
  0x31   :  { %s360_s0 = smov 128   ;;  %s361_s18 = smov 8  }
  0x32   :  { %43 = dma.hbm_to_vmem [thread:$0]  %s444_s2, 2048, %s38_s13, [#allocation6], %s360_s0, %s360_s0, %s361_s18  }
  0x33   :  { %351 = dma.done.wait [#allocation3], 128  }
  0x34   :  { %352 = vsyncadd [#allocation3], 4294967168 }
  0x35   :  { %353 = dma.done.wait [#allocation6], 2176  }
  0x36   :  { %354 = vsyncadd [#allocation6], 4294965120  ;;  %v362_v0 = vmov 0.0|0.0   ;;  %v55_v1 = vld [vmem:[#allocation5] sm:$0xff]  ;;  %v63_v2 = vld [vmem:[#allocation7] sm:$0xff]  ;;  %vm363_vm0 = vmmov 0  }
  0x37   :  { %228 = vmatprep.subr.bf16.mxu0 %v362_v0  ;;  %v64_v3 = vld [vmem:[#allocation7 + $0x8] sm:$0xff]  ;;  %v56_v4 = vmul.f32 %v55_v1, %v55_v1  ;;  %v65_v6 = vld [vmem:[#allocation7 + $0x10] sm:$0xff]  ;;  %v66_v7 = vld [vmem:[#allocation7 + $0x18] sm:$0xff]  ;;  %v364_v27 = vmov 0.0   ;;  %s365_s26 = smov [#allocation8]  }
  0x38   :  { %v229_v5 = vpack.c.bf16 %v64_v3, %v63_v2  ;;  %v232_v8 = vpack.c.bf16 %v66_v7, %v65_v6  ;;  %v67_v9 = vld [vmem:[#allocation7 + $0x20] sm:$0xff]  ;;  %v68_v10 = vld [vmem:[#allocation7 + $0x28] sm:$0xff]  ;;  %v69_v12 = vld [vmem:[#allocation7 + $0x30] sm:$0xff]  ;;  %225 = vmatprep.mubr.msk.f32.mxu0 %vm363_vm0, %v364_v27  ;;  %s165_s27 = sshll.u32 %s365_s26, 4  ;;  %s166_s27 = int_to_ptr.vmem [resolvable:$true] %s165_s27 }
  0x39   :  { %57 = vadd.xlane.f32.xlu0 %v56_v4  ;;  %v235_v11 = vpack.c.bf16 %v68_v10, %v67_v9  ;;  %v70_v13 = vld [vmem:[#allocation7 + $0x38] sm:$0xff]  ;;  %v71_v15 = vld [vmem:[#allocation7 + $0x40] sm:$0xff]  ;;  %v72_v16 = vld [vmem:[#allocation7 + $0x48] sm:$0xff]  ;;  %s329_s28 = scalar_lea.vmem %s166_s27, 128  ;;  %p334_p11 = scmp.lt.s32.totalorder %s166_s27, %s166_s27 }
  0x3a   :  { %230 = vmatpush3.bf16.msra.mxu0 %v229_v5  ;;  %v238_v14 = vpack.c.bf16 %v70_v13, %v69_v12  ;;  %v241_v17 = vpack.c.bf16 %v72_v16, %v71_v15  ;;  %v73_v18 = vld [vmem:[#allocation7 + $0x50] sm:$0xff]  ;;  %v74_v19 = vld [vmem:[#allocation7 + $0x58] sm:$0xff]  ;;  %v75_v21 = vld [vmem:[#allocation7 + $0x60] sm:$0xff]  ;;  %p330_p10 = scmp.ne.s32.totalorder %s166_s27, %s329_s28  ;;  %p335_p12 = scmp.lt.s32.totalorder %s329_s28, %s329_s28 }
  0x3b   :  { %231 = vmatprep.subr.bf16.mxu0 %v362_v0  ;;  %v244_v20 = vpack.c.bf16 %v74_v19, %v73_v18  ;;  %v76_v22 = vld [vmem:[#allocation7 + $0x68] sm:$0xff]  ;;  %v77_v24 = vld [vmem:[#allocation7 + $0x70] sm:$0xff]  ;;  %v78_v25 = vld [vmem:[#allocation7 + $0x78] sm:$0xff] }
  0x3c   :  { %v247_v23 = vpack.c.bf16 %v76_v22, %v75_v21  ;;  %v250_v26 = vpack.c.bf16 %v78_v25, %v77_v24  ;;  %v79_v32 = vld [vmem:[#allocation2] sm:$0xff]  ;;  %p336_p13 = por %p335_p12, %p334_p11 }
  0x3d   :  { %v175_v35 = vld [vmem:[%s445_s3] ss:$0 sm:$0xff] }
  0x3e   :  { %233 = vmatpush3.bf16.msra.mxu0 %v232_v8  ;;  %p337_p0 = pnand %p336_p13, %p330_p10 }
  0x3f   :  { %234 = vmatprep.subr.bf16.mxu0 %v362_v0 }
  0x42   :  { %236 = vmatpush3.bf16.msra.mxu0 %v235_v11 }
  0x43   :  { %237 = vmatprep.subr.bf16.mxu0 %v362_v0 }
  0x46   :  { %239 = vmatpush3.bf16.msra.mxu0 %v238_v14 }
  0x47   :  { %240 = vmatprep.subr.bf16.mxu0 %v362_v0 }
  0x4a   :  { %242 = vmatpush3.bf16.msra.mxu0 %v241_v17 }
  0x4b   :  { %243 = vmatprep.subr.bf16.mxu0 %v362_v0 }
  0x4e   :  { %245 = vmatpush3.bf16.msra.mxu0 %v244_v20 }
  0x4f   :  { %246 = vmatprep.subr.bf16.mxu0 %v362_v0 }
  0x52   :  { %248 = vmatpush3.bf16.msra.mxu0 %v247_v23 }
  0x53   :  { %249 = vmatprep.subr.bf16.mxu0 %v362_v0 }
  0x56   :  { %251 = vmatpush3.bf16.msra.mxu0 %v250_v26 }
  0xc6   :  { %v58_v28 = vpop.xlane.xlu0 %57 }
  0xc7   :  { %v59_v29 = vmax.f32 %v58_v28, 1e-30 }
  0xc9   :  { %261 = vrsqrt.f32 %v59_v29 }
  0xd3   :  { %v262_v30 = vpop.eup %261 }
  0xd4   :  { %v61_v31 = vmul.f32 0.05, %v262_v30 }
  0xd6   :  { %v62_v33 = vmul.f32 %v61_v31, %v55_v1 }
  0xd8   :  { %v80_v34 = vadd.f32 %v79_v32, %v62_v33 }
  0xda   :  { %226 = vmatmul.mubr.f32.vlgmr.msra.gmra.mrb[0].mxu0 %v80_v34 }
 0x1ad   :  { %v154_v36 = vpop.f32.mrb[0].mxu0 }
 0x1ae   :  { %v155_v37 = vadd.f32 %v175_v35, %v154_v36  ;;  %v227_v38 = vpop.f32.mrb[1].mxu0 }
 0x1b0   :  { %158 = vst [vmem:[#allocation8] sm:$0xff] %v155_v37 }
 0x1b1   :  { %340 = shalt.err (!%p337_p0)
}
 0x1b2   :  { %s341_s5 = scalar_lea.hbm %s446_s4, 128 }
 0x1b3   :  { %p342_p1 = scmp.ne.s32.totalorder %s446_s4, %s341_s5  ;;  %p345_p2 = scmp.lt.u32.totalorder %s341_s5, %s446_s4 }
 0x1b5   :  { %p347_p3 = pnand %p345_p2, %p342_p1 }
 0x1b7   :  { %350 = shalt.err (!%p347_p3)
}
 0x1b8   :  { %168 = dma.vmem_to_hbm [thread:$0]  %s166_s27, 128, %s446_s4, [#allocation4]  }
 0x1b9   :  { %355 = dma.done.wait [#allocation4], 128  }
 0x1ba   :  { %356 = vsyncadd [#allocation4], 4294967168 }
 0x1bb   :  { %172 = vsyncpa [#allocation3], 1 }
 0x1bc   :  { %173 = vsyncpa [#allocation6], 1 }
 0x1bd   :  { %174 = vsyncpa [#allocation4], 1 }

// kernel: tpu_custom_call.1
= control target key start
LH: loop header
LB: loop body
LE: loop exit
PB: predicated region body
PF: predicated region fallthrough
CT: control target
= control target key end

     0   :  { %9 = vsyncpa [#allocation3], 0  ;;  %s442_s0 = inlined_call_operand.hbm [shape: f32[8,128], index: 0, kind: input, shape index: {}]   ;;  %s443_s1 = inlined_call_operand.hbm [shape: f32[8,128], index: 1, kind: input, shape index: {}]   ;;  %s444_s2 = inlined_call_operand.hbm [shape: f32[128,128], index: 2, kind: input, shape index: {}]   ;;  %s445_s3 = inlined_call_operand.vmem [shape: f32[1,128], index: 3, kind: input, shape index: {}]   ;;  %s446_s4 = inlined_call_operand.hbm [shape: f32[8,128], index: 4, kind: output, shape index: {}]  }
   0x1   :  { %10 = vsyncpa [#allocation6], 0 }
   0x2   :  { %11 = vsyncpa [#allocation4], 0  ;;  %s357_s15 = smov [#allocation5]   ;;  %s358_s17 = smov [#allocation2]  }
   0x3   :  { %s28_s16 = sshll.u32 %s357_s15, 4  ;;  %s18_s18 = sshll.u32 %s358_s17, 4  ;;  %s29_s16 = int_to_ptr.vmem [resolvable:$true] %s28_s16  ;;  %s19_s18 = int_to_ptr.vmem [resolvable:$true] %s18_s18 }
   0x4   :  { %s263_s21 = scalar_lea.hbm %s443_s1, 128 }
   0x5   :  { %p264_p0 = scmp.ne.s32.totalorder %s443_s1, %s263_s21  ;;  %p267_p1 = scmp.lt.u32.totalorder %s263_s21, %s443_s1 }
   0x7   :  { %p269_p2 = pnand %p267_p1, %p264_p0 }
   0x9   :  { %272 = shalt.err (!%p269_p2)
}
   0xa   :  { %s273_s26 = scalar_lea.vmem %s29_s16, 128  ;;  %p278_p4 = scmp.lt.s32.totalorder %s29_s16, %s29_s16 }
   0xb   :  { %p274_p3 = scmp.ne.s32.totalorder %s29_s16, %s273_s26  ;;  %p279_p5 = scmp.lt.s32.totalorder %s273_s26, %s273_s26 }
   0xd   :  { %p280_p6 = por %p279_p5, %p278_p4 }
   0xf   :  { %p281_p7 = pnand %p280_p6, %p274_p3 }
  0x11   :  { %284 = shalt.err (!%p281_p7)
}
  0x12   :  { %31 = dma.hbm_to_vmem [thread:$0]  %s443_s1, 128, %s29_s16, [#allocation6]  }
  0x13   :  { %s285_s5 = scalar_lea.hbm %s442_s0, 128 }
  0x14   :  { %p286_p8 = scmp.ne.s32.totalorder %s442_s0, %s285_s5  ;;  %p289_p9 = scmp.lt.u32.totalorder %s285_s5, %s442_s0 }
  0x16   :  { %p291_p10 = pnand %p289_p9, %p286_p8 }
  0x18   :  { %294 = shalt.err (!%p291_p10)
}
  0x19   :  { %s295_s10 = scalar_lea.vmem %s19_s18, 128  ;;  %p300_p12 = scmp.lt.s32.totalorder %s19_s18, %s19_s18 }
  0x1a   :  { %p296_p11 = scmp.ne.s32.totalorder %s19_s18, %s295_s10  ;;  %p301_p13 = scmp.lt.s32.totalorder %s295_s10, %s295_s10 }
  0x1c   :  { %p302_p0 = por %p301_p13, %p300_p12 }
  0x1e   :  { %p303_p1 = pnand %p302_p0, %p296_p11 }
  0x20   :  { %306 = shalt.err (!%p303_p1)
}
  0x21   :  { %21 = dma.hbm_to_vmem [thread:$0]  %s442_s0, 128, %s19_s18, [#allocation3]  }
  0x22   :  { %s359_s12 = smov [#allocation7]   ;;  %s307_s16 = scalar_lea.hbm %s444_s2, 2048 }
  0x23   :  { %s37_s13 = sshll.u32 %s359_s12, 4  ;;  %p308_p2 = scmp.ne.s32.totalorder %s444_s2, %s307_s16  ;;  %s38_s13 = int_to_ptr.vmem [resolvable:$true] %s37_s13 }
  0x24   :  { %p311_p3 = scmp.lt.u32.totalorder %s307_s16, %s444_s2 }
  0x26   :  { %p313_p4 = pnand %p311_p3, %p308_p2 }
  0x28   :  { %316 = shalt.err (!%p313_p4)
}
  0x29   :  { %s317_s22 = scalar_lea.vmem %s38_s13, 2048  ;;  %p322_p6 = scmp.lt.s32.totalorder %s38_s13, %s38_s13 }
  0x2a   :  { %p318_p5 = scmp.ne.s32.totalorder %s38_s13, %s317_s22  ;;  %p323_p7 = scmp.lt.s32.totalorder %s317_s22, %s317_s22 }
  0x2c   :  { %p324_p8 = por %p323_p7, %p322_p6 }
  0x2e   :  { %p325_p9 = pnand %p324_p8, %p318_p5 }
  0x30   :  { %328 = shalt.err (!%p325_p9)
}
  0x31   :  { %s360_s0 = smov 128   ;;  %s361_s18 = smov 8  }
  0x32   :  { %43 = dma.hbm_to_vmem [thread:$0]  %s444_s2, 2048, %s38_s13, [#allocation6], %s360_s0, %s360_s0, %s361_s18  }
  0x33   :  { %351 = dma.done.wait [#allocation3], 128  }
  0x34   :  { %352 = vsyncadd [#allocation3], 4294967168 }
  0x35   :  { %353 = dma.done.wait [#allocation6], 2176  }
  0x36   :  { %354 = vsyncadd [#allocation6], 4294965120  ;;  %v362_v0 = vmov 0.0|0.0   ;;  %v55_v1 = vld [vmem:[#allocation5] sm:$0xff]  ;;  %v63_v2 = vld [vmem:[#allocation7] sm:$0xff]  ;;  %vm363_vm0 = vmmov 0  }
  0x37   :  { %228 = vmatprep.subr.bf16.mxu0 %v362_v0  ;;  %v64_v3 = vld [vmem:[#allocation7 + $0x8] sm:$0xff]  ;;  %v56_v4 = vmul.f32 %v55_v1, %v55_v1  ;;  %v65_v6 = vld [vmem:[#allocation7 + $0x10] sm:$0xff]  ;;  %v66_v7 = vld [vmem:[#allocation7 + $0x18] sm:$0xff]  ;;  %v364_v27 = vmov 0.0   ;;  %s365_s26 = smov [#allocation8]  }
  0x38   :  { %v229_v5 = vpack.c.bf16 %v64_v3, %v63_v2  ;;  %v232_v8 = vpack.c.bf16 %v66_v7, %v65_v6  ;;  %v67_v9 = vld [vmem:[#allocation7 + $0x20] sm:$0xff]  ;;  %v68_v10 = vld [vmem:[#allocation7 + $0x28] sm:$0xff]  ;;  %v69_v12 = vld [vmem:[#allocation7 + $0x30] sm:$0xff]  ;;  %225 = vmatprep.mubr.msk.f32.mxu0 %vm363_vm0, %v364_v27  ;;  %s165_s27 = sshll.u32 %s365_s26, 4  ;;  %s166_s27 = int_to_ptr.vmem [resolvable:$true] %s165_s27 }
  0x39   :  { %57 = vadd.xlane.f32.xlu0 %v56_v4  ;;  %v235_v11 = vpack.c.bf16 %v68_v10, %v67_v9  ;;  %v70_v13 = vld [vmem:[#allocation7 + $0x38] sm:$0xff]  ;;  %v71_v15 = vld [vmem:[#allocation7 + $0x40] sm:$0xff]  ;;  %v72_v16 = vld [vmem:[#allocation7 + $0x48] sm:$0xff]  ;;  %s329_s28 = scalar_lea.vmem %s166_s27, 128  ;;  %p334_p11 = scmp.lt.s32.totalorder %s166_s27, %s166_s27 }
  0x3a   :  { %230 = vmatpush3.bf16.msra.mxu0 %v229_v5  ;;  %v238_v14 = vpack.c.bf16 %v70_v13, %v69_v12  ;;  %v241_v17 = vpack.c.bf16 %v72_v16, %v71_v15  ;;  %v73_v18 = vld [vmem:[#allocation7 + $0x50] sm:$0xff]  ;;  %v74_v19 = vld [vmem:[#allocation7 + $0x58] sm:$0xff]  ;;  %v75_v21 = vld [vmem:[#allocation7 + $0x60] sm:$0xff]  ;;  %p330_p10 = scmp.ne.s32.totalorder %s166_s27, %s329_s28  ;;  %p335_p12 = scmp.lt.s32.totalorder %s329_s28, %s329_s28 }
  0x3b   :  { %231 = vmatprep.subr.bf16.mxu0 %v362_v0  ;;  %v244_v20 = vpack.c.bf16 %v74_v19, %v73_v18  ;;  %v76_v22 = vld [vmem:[#allocation7 + $0x68] sm:$0xff]  ;;  %v77_v24 = vld [vmem:[#allocation7 + $0x70] sm:$0xff]  ;;  %v78_v25 = vld [vmem:[#allocation7 + $0x78] sm:$0xff] }
  0x3c   :  { %v247_v23 = vpack.c.bf16 %v76_v22, %v75_v21  ;;  %v250_v26 = vpack.c.bf16 %v78_v25, %v77_v24  ;;  %v79_v32 = vld [vmem:[#allocation2] sm:$0xff]  ;;  %p336_p13 = por %p335_p12, %p334_p11 }
  0x3d   :  { %v175_v35 = vld [vmem:[%s445_s3] ss:$0 sm:$0xff] }
  0x3e   :  { %233 = vmatpush3.bf16.msra.mxu0 %v232_v8  ;;  %p337_p0 = pnand %p336_p13, %p330_p10 }
  0x3f   :  { %234 = vmatprep.subr.bf16.mxu0 %v362_v0 }
  0x42   :  { %236 = vmatpush3.bf16.msra.mxu0 %v235_v11 }
  0x43   :  { %237 = vmatprep.subr.bf16.mxu0 %v362_v0 }
  0x46   :  { %239 = vmatpush3.bf16.msra.mxu0 %v238_v14 }
  0x47   :  { %240 = vmatprep.subr.bf16.mxu0 %v362_v0 }
  0x4a   :  { %242 = vmatpush3.bf16.msra.mxu0 %v241_v17 }
  0x4b   :  { %243 = vmatprep.subr.bf16.mxu0 %v362_v0 }
  0x4e   :  { %245 = vmatpush3.bf16.msra.mxu0 %v244_v20 }
  0x4f   :  { %246 = vmatprep.subr.bf16.mxu0 %v362_v0 }
  0x52   :  { %248 = vmatpush3.bf16.msra.mxu0 %v247_v23 }
  0x53   :  { %249 = vmatprep.subr.bf16.mxu0 %v362_v0 }
  0x56   :  { %251 = vmatpush3.bf16.msra.mxu0 %v250_v26 }
  0xc6   :  { %v58_v28 = vpop.xlane.xlu0 %57 }
  0xc7   :  { %v59_v29 = vmax.f32 %v58_v28, 1e-30 }
  0xc9   :  { %261 = vrsqrt.f32 %v59_v29 }
  0xd3   :  { %v262_v30 = vpop.eup %261 }
  0xd4   :  { %v61_v31 = vmul.f32 0.05, %v262_v30 }
  0xd6   :  { %v62_v33 = vmul.f32 %v61_v31, %v55_v1 }
  0xd8   :  { %v80_v34 = vadd.f32 %v79_v32, %v62_v33 }
  0xda   :  { %226 = vmatmul.mubr.f32.vlgmr.msra.gmra.mrb[0].mxu0 %v80_v34 }
 0x1ad   :  { %v154_v36 = vpop.f32.mrb[0].mxu0 }
 0x1ae   :  { %v155_v37 = vadd.f32 %v175_v35, %v154_v36  ;;  %v227_v38 = vpop.f32.mrb[1].mxu0 }
 0x1b0   :  { %158 = vst [vmem:[#allocation8] sm:$0xff] %v155_v37 }
 0x1b1   :  { %340 = shalt.err (!%p337_p0)
}
 0x1b2   :  { %s341_s5 = scalar_lea.hbm %s446_s4, 128 }
 0x1b3   :  { %p342_p1 = scmp.ne.s32.totalorder %s446_s4, %s341_s5  ;;  %p345_p2 = scmp.lt.u32.totalorder %s341_s5, %s446_s4 }
 0x1b5   :  { %p347_p3 = pnand %p345_p2, %p342_p1 }
 0x1b7   :  { %350 = shalt.err (!%p347_p3)
}
 0x1b8   :  { %168 = dma.vmem_to_hbm [thread:$0]  %s166_s27, 128, %s446_s4, [#allocation4]  }
 0x1b9   :  { %355 = dma.done.wait [#allocation4], 128  }
 0x1ba   :  { %356 = vsyncadd [#allocation4], 4294967168 }
 0x1bb   :  { %172 = vsyncpa [#allocation3], 1 }
 0x1bc   :  { %173 = vsyncpa [#allocation6], 1 }
 0x1bd   :  { %174 = vsyncpa [#allocation4], 1 }

</bundles_post_ra>
